<compile_context>
chip_gen: v5e
topology: v5e:2x2
jax: 0.10.0
libtpu: 0.0.40
codegen_flags: <defaults>
</compile_context>

<pallas_src>
import functools

import jax
import jax.numpy as jnp
from jax.experimental import pallas as pl
from jax.experimental.pallas import tpu as pltpu

LANES = 128
SUBLANES = 8
VREG_ROWS = LANES * SUBLANES  # 1024 batch rows == one fully dense f32 vreg set


def mlp_kernel(w1_ref, b1_ref, w2_ref, b2_ref, x_ref, o_ref):
    """One batch tile.

    x_ref : (8, TB, 128) f32 VMEM -- feature k is x_ref[k], a dense (TB,128) slab
    w1_ref: (3, 8) f32 SMEM   b1_ref: (3,) f32 SMEM    (PyTorch [out, in] layout)
    w2_ref: (3,)  f32 SMEM    b2_ref: (1,) f32 SMEM
    o_ref : (TB, 128) f32 VMEM -- lane-dense output tile
    """
    x = x_ref[...]  # (8, TB, 128), loaded once; x[k] is a contiguous slab
    y = None
    for j in range(3):                       # hidden units, static unroll
        h = b1_ref[j] + w1_ref[j, 0] * x[0]  # scalar-broadcast FMA chain on VPU
        for k in range(1, 8):                # K = 8, unrolled
            h = h + w1_ref[j, k] * x[k]
        hj = jax.nn.sigmoid(h)               # EUP (transcendental) path
        contrib = w2_ref[j] * hj             # layer-2 contraction, K = 3, unrolled
        y = (b2_ref[0] + contrib) if j == 0 else (y + contrib)
    o_ref[...] = jax.nn.sigmoid(y).astype(o_ref.dtype)


@functools.partial(jax.jit, static_argnames=("rows_per_tile",))
def mlp_forward(x, w1, b1, w2, b2, *, rows_per_tile=4096):
    """x: [N, 8] f32; w1: [3, 8]; b1: [3]; w2: [3]; b2: [1] (PyTorch layouts)."""
    n = x.shape[0]
    assert x.shape[1] == 8, "model expects 8 input features"

    # Tile size in batch rows: a multiple of 1024 (8 sublanes x 128 lanes of f32)
    # so every vreg of the x tile and the output tile is fully dense.
    n_ceil = -(-n // VREG_ROWS) * VREG_ROWS
    tile_rows = min(rows_per_tile, n_ceil)
    tile_rows = max(VREG_ROWS, (tile_rows // VREG_ROWS) * VREG_ROWS)
    n_pad = -(-n // tile_rows) * tile_rows
    num_tiles = n_pad // tile_rows
    tb = tile_rows // LANES                  # sublane-rows per tile (multiple of 8)

    # Wrapper-side layout plumbing (not in-kernel): [N,8] -> [8, n_pad/128, 128].
    xp = jnp.pad(x.astype(jnp.float32), ((0, n_pad - n), (0, 0)))
    xt = xp.T.reshape(8, n_pad // LANES, LANES)

    out = pl.pallas_call(
        mlp_kernel,
        out_shape=jax.ShapeDtypeStruct((n_pad // LANES, LANES), jnp.float32),
        grid=(num_tiles,),
        in_specs=[
            pl.BlockSpec(memory_space=pltpu.MemorySpace.SMEM),    # w1 (3,8) scalars
            pl.BlockSpec(memory_space=pltpu.MemorySpace.SMEM),    # b1 (3,)
            pl.BlockSpec(memory_space=pltpu.MemorySpace.SMEM),    # w2 (3,)
            pl.BlockSpec(memory_space=pltpu.MemorySpace.SMEM),    # b2 (1,)
            pl.BlockSpec((8, tb, LANES), lambda i: (0, i, 0)),    # x batch tile
        ],
        out_specs=pl.BlockSpec((tb, LANES), lambda i: (i, 0)),
        compiler_params=pltpu.CompilerParams(
            dimension_semantics=("parallel",),
        ),
        cost_estimate=pl.CostEstimate(
            flops=54 * n_pad,                 # (2*8*3 + 2*3) per row
            transcendentals=4 * n_pad,        # 4 sigmoids per row
            bytes_accessed=(8 * 4 + 4) * n_pad,
        ),
    )(w1, b1, w2, b2, xt)

    # Output slab element (r, l) is batch row r*128 + l -> flatten and trim padding.
    return out.reshape(n_pad, 1)[:n]


def init_params(key):
    """torch.nn.Linear-style U(-1/sqrt(fan_in), +1/sqrt(fan_in)) init, torch layouts."""
    k1, k2, k3, k4 = jax.random.split(key, 4)
    bound1 = 1.0 / jnp.sqrt(8.0)
    bound2 = 1.0 / jnp.sqrt(3.0)
    w1 = jax.random.uniform(k1, (3, 8), jnp.float32, -bound1, bound1)  # l1.weight [out, in]
    b1 = jax.random.uniform(k2, (3,), jnp.float32, -bound1, bound1)    # l1.bias
    w2 = jax.random.uniform(k3, (3,), jnp.float32, -bound2, bound2)    # l2.weight squeezed
    b2 = jax.random.uniform(k4, (1,), jnp.float32, -bound2, bound2)    # l2.bias
    return w1, b1, w2, b2


def mlp_reference(x, w1, b1, w2, b2):
    h = jax.nn.sigmoid(x @ w1.T + b1)
    return jax.nn.sigmoid(h @ w2.reshape(3, 1) + b2)


if __name__ == "__main__":
    key = jax.random.PRNGKey(0)
    kx, kp = jax.random.split(key)
    w1, b1, w2, b2 = init_params(kp)

    # 759 = diabetes.csv row count (single padded tile); 5000 exercises a
    # multi-tile grid plus last-tile padding.
    for n in (759, 5000):
        x = jax.random.uniform(jax.random.fold_in(kx, n), (n, 8), jnp.float32)
        y_pred = jax.block_until_ready(mlp_forward(x, w1, b1, w2, b2))
        y_ref = mlp_reference(x, w1, b1, w2, b2)
        assert y_pred.shape == (n, 1)
        assert jnp.allclose(y_pred, y_ref, atol=1e-5), f"mismatch vs reference at N={n}"

    print("KERNEL_OK")
</pallas_src>

<mosaic_0001>
module attributes {stable_mosaic.version = 11 : i64} {
  func.func @mlp_kernel(%arg0: i32, %arg1: memref<3x8xf32, #tpu.memory_space<smem>>, %arg2: memref<3xf32, #tpu.memory_space<smem>>, %arg3: memref<3xf32, #tpu.memory_space<smem>>, %arg4: memref<1xf32, #tpu.memory_space<smem>>, %arg5: memref<8x8x128xf32, #tpu.memory_space<vmem>>, %arg6: memref<8x128xf32, #tpu.memory_space<vmem>>) attributes {dimension_semantics = [#tpu.dimension_semantics<parallel>], iteration_bounds = array<i64: 1>, scalar_prefetch = 0 : i64, scratch_operands = 0 : i64, tpu.core_type = #tpu.core_type<tc>, window_params = [{transform_indices = @transform_0, window_bounds = array<i64: 3, 8>}, {transform_indices = @transform_1, window_bounds = array<i64: 3>}, {transform_indices = @transform_2, window_bounds = array<i64: 3>}, {transform_indices = @transform_3, window_bounds = array<i64: 1>}, {transform_indices = @transform_4, window_bounds = array<i64: 8, 8, 128>}, {transform_indices = @transform_5, window_bounds = array<i64: 8, 128>}]} {
    %c0 = arith.constant 0 : index
    %c0_0 = arith.constant 0 : index
    %c0_1 = arith.constant 0 : index
    %0 = vector.load %arg5[%c0, %c0_0, %c0_1] : memref<8x8x128xf32, #tpu.memory_space<vmem>>, vector<8x8x128xf32>
    %c0_2 = arith.constant 0 : index
    %1 = memref.load %arg2[%c0_2] : memref<3xf32, #tpu.memory_space<smem>>
    %c0_3 = arith.constant 0 : index
    %c0_4 = arith.constant 0 : index
    %2 = memref.load %arg1[%c0_3, %c0_4] : memref<3x8xf32, #tpu.memory_space<smem>>
    %3 = vector.extract_strided_slice %0 {offsets = [0, 0, 0], sizes = [1, 8, 128], strides = [1, 1, 1]} : vector<8x8x128xf32> to vector<1x8x128xf32>
    %4 = vector.shape_cast %3 : vector<1x8x128xf32> to vector<8x128xf32>
    %5 = vector.broadcast %2 : f32 to vector<8x128xf32>
    %6 = arith.mulf %5, %4 : vector<8x128xf32>
    %7 = vector.broadcast %1 : f32 to vector<8x128xf32>
    %8 = arith.addf %7, %6 : vector<8x128xf32>
    %c0_5 = arith.constant 0 : index
    %c1 = arith.constant 1 : index
    %9 = memref.load %arg1[%c0_5, %c1] : memref<3x8xf32, #tpu.memory_space<smem>>
    %10 = vector.extract_strided_slice %0 {offsets = [1, 0, 0], sizes = [1, 8, 128], strides = [1, 1, 1]} : vector<8x8x128xf32> to vector<1x8x128xf32>
    %11 = vector.shape_cast %10 : vector<1x8x128xf32> to vector<8x128xf32>
    %12 = vector.broadcast %9 : f32 to vector<8x128xf32>
    %13 = arith.mulf %12, %11 : vector<8x128xf32>
    %14 = arith.addf %8, %13 : vector<8x128xf32>
    %c0_6 = arith.constant 0 : index
    %c2 = arith.constant 2 : index
    %15 = memref.load %arg1[%c0_6, %c2] : memref<3x8xf32, #tpu.memory_space<smem>>
    %16 = vector.extract_strided_slice %0 {offsets = [2, 0, 0], sizes = [1, 8, 128], strides = [1, 1, 1]} : vector<8x8x128xf32> to vector<1x8x128xf32>
    %17 = vector.shape_cast %16 : vector<1x8x128xf32> to vector<8x128xf32>
    %18 = vector.broadcast %15 : f32 to vector<8x128xf32>
    %19 = arith.mulf %18, %17 : vector<8x128xf32>
    %20 = arith.addf %14, %19 : vector<8x128xf32>
    %c0_7 = arith.constant 0 : index
    %c3 = arith.constant 3 : index
    %21 = memref.load %arg1[%c0_7, %c3] : memref<3x8xf32, #tpu.memory_space<smem>>
    %22 = vector.extract_strided_slice %0 {offsets = [3, 0, 0], sizes = [1, 8, 128], strides = [1, 1, 1]} : vector<8x8x128xf32> to vector<1x8x128xf32>
    %23 = vector.shape_cast %22 : vector<1x8x128xf32> to vector<8x128xf32>
    %24 = vector.broadcast %21 : f32 to vector<8x128xf32>
    %25 = arith.mulf %24, %23 : vector<8x128xf32>
    %26 = arith.addf %20, %25 : vector<8x128xf32>
    %c0_8 = arith.constant 0 : index
    %c4 = arith.constant 4 : index
    %27 = memref.load %arg1[%c0_8, %c4] : memref<3x8xf32, #tpu.memory_space<smem>>
    %28 = vector.extract_strided_slice %0 {offsets = [4, 0, 0], sizes = [1, 8, 128], strides = [1, 1, 1]} : vector<8x8x128xf32> to vector<1x8x128xf32>
    %29 = vector.shape_cast %28 : vector<1x8x128xf32> to vector<8x128xf32>
    %30 = vector.broadcast %27 : f32 to vector<8x128xf32>
    %31 = arith.mulf %30, %29 : vector<8x128xf32>
    %32 = arith.addf %26, %31 : vector<8x128xf32>
    %c0_9 = arith.constant 0 : index
    %c5 = arith.constant 5 : index
    %33 = memref.load %arg1[%c0_9, %c5] : memref<3x8xf32, #tpu.memory_space<smem>>
    %34 = vector.extract_strided_slice %0 {offsets = [5, 0, 0], sizes = [1, 8, 128], strides = [1, 1, 1]} : vector<8x8x128xf32> to vector<1x8x128xf32>
    %35 = vector.shape_cast %34 : vector<1x8x128xf32> to vector<8x128xf32>
    %36 = vector.broadcast %33 : f32 to vector<8x128xf32>
    %37 = arith.mulf %36, %35 : vector<8x128xf32>
    %38 = arith.addf %32, %37 : vector<8x128xf32>
    %c0_10 = arith.constant 0 : index
    %c6 = arith.constant 6 : index
    %39 = memref.load %arg1[%c0_10, %c6] : memref<3x8xf32, #tpu.memory_space<smem>>
    %40 = vector.extract_strided_slice %0 {offsets = [6, 0, 0], sizes = [1, 8, 128], strides = [1, 1, 1]} : vector<8x8x128xf32> to vector<1x8x128xf32>
    %41 = vector.shape_cast %40 : vector<1x8x128xf32> to vector<8x128xf32>
    %42 = vector.broadcast %39 : f32 to vector<8x128xf32>
    %43 = arith.mulf %42, %41 : vector<8x128xf32>
    %44 = arith.addf %38, %43 : vector<8x128xf32>
    %c0_11 = arith.constant 0 : index
    %c7 = arith.constant 7 : index
    %45 = memref.load %arg1[%c0_11, %c7] : memref<3x8xf32, #tpu.memory_space<smem>>
    %46 = vector.extract_strided_slice %0 {offsets = [7, 0, 0], sizes = [1, 8, 128], strides = [1, 1, 1]} : vector<8x8x128xf32> to vector<1x8x128xf32>
    %47 = vector.shape_cast %46 : vector<1x8x128xf32> to vector<8x128xf32>
    %48 = vector.broadcast %45 : f32 to vector<8x128xf32>
    %49 = arith.mulf %48, %47 : vector<8x128xf32>
    %50 = arith.addf %44, %49 : vector<8x128xf32>
    %51 = arith.negf %50 : vector<8x128xf32>
    %52 = math.exp %51 : vector<8x128xf32>
    %cst = arith.constant 1.000000e+00 : f32
    %53 = vector.broadcast %cst : f32 to vector<8x128xf32>
    %54 = arith.addf %53, %52 : vector<8x128xf32>
    %55 = arith.divf %53, %54 : vector<8x128xf32>
    %c0_12 = arith.constant 0 : index
    %56 = memref.load %arg3[%c0_12] : memref<3xf32, #tpu.memory_space<smem>>
    %57 = vector.broadcast %56 : f32 to vector<8x128xf32>
    %58 = arith.mulf %57, %55 : vector<8x128xf32>
    %c0_13 = arith.constant 0 : index
    %59 = memref.load %arg4[%c0_13] : memref<1xf32, #tpu.memory_space<smem>>
    %60 = vector.broadcast %59 : f32 to vector<8x128xf32>
    %61 = arith.addf %60, %58 : vector<8x128xf32>
    %c1_14 = arith.constant 1 : index
    %62 = memref.load %arg2[%c1_14] : memref<3xf32, #tpu.memory_space<smem>>
    %c1_15 = arith.constant 1 : index
    %c0_16 = arith.constant 0 : index
    %63 = memref.load %arg1[%c1_15, %c0_16] : memref<3x8xf32, #tpu.memory_space<smem>>
    %64 = vector.extract_strided_slice %0 {offsets = [0, 0, 0], sizes = [1, 8, 128], strides = [1, 1, 1]} : vector<8x8x128xf32> to vector<1x8x128xf32>
    %65 = vector.shape_cast %64 : vector<1x8x128xf32> to vector<8x128xf32>
    %66 = vector.broadcast %63 : f32 to vector<8x128xf32>
    %67 = arith.mulf %66, %65 : vector<8x128xf32>
    %68 = vector.broadcast %62 : f32 to vector<8x128xf32>
    %69 = arith.addf %68, %67 : vector<8x128xf32>
    %c1_17 = arith.constant 1 : index
    %c1_18 = arith.constant 1 : index
    %70 = memref.load %arg1[%c1_17, %c1_18] : memref<3x8xf32, #tpu.memory_space<smem>>
    %71 = vector.extract_strided_slice %0 {offsets = [1, 0, 0], sizes = [1, 8, 128], strides = [1, 1, 1]} : vector<8x8x128xf32> to vector<1x8x128xf32>
    %72 = vector.shape_cast %71 : vector<1x8x128xf32> to vector<8x128xf32>
    %73 = vector.broadcast %70 : f32 to vector<8x128xf32>
    %74 = arith.mulf %73, %72 : vector<8x128xf32>
    %75 = arith.addf %69, %74 : vector<8x128xf32>
    %c1_19 = arith.constant 1 : index
    %c2_20 = arith.constant 2 : index
    %76 = memref.load %arg1[%c1_19, %c2_20] : memref<3x8xf32, #tpu.memory_space<smem>>
    %77 = vector.extract_strided_slice %0 {offsets = [2, 0, 0], sizes = [1, 8, 128], strides = [1, 1, 1]} : vector<8x8x128xf32> to vector<1x8x128xf32>
    %78 = vector.shape_cast %77 : vector<1x8x128xf32> to vector<8x128xf32>
    %79 = vector.broadcast %76 : f32 to vector<8x128xf32>
    %80 = arith.mulf %79, %78 : vector<8x128xf32>
    %81 = arith.addf %75, %80 : vector<8x128xf32>
    %c1_21 = arith.constant 1 : index
    %c3_22 = arith.constant 3 : index
    %82 = memref.load %arg1[%c1_21, %c3_22] : memref<3x8xf32, #tpu.memory_space<smem>>
    %83 = vector.extract_strided_slice %0 {offsets = [3, 0, 0], sizes = [1, 8, 128], strides = [1, 1, 1]} : vector<8x8x128xf32> to vector<1x8x128xf32>
    %84 = vector.shape_cast %83 : vector<1x8x128xf32> to vector<8x128xf32>
    %85 = vector.broadcast %82 : f32 to vector<8x128xf32>
    %86 = arith.mulf %85, %84 : vector<8x128xf32>
    %87 = arith.addf %81, %86 : vector<8x128xf32>
    %c1_23 = arith.constant 1 : index
    %c4_24 = arith.constant 4 : index
    %88 = memref.load %arg1[%c1_23, %c4_24] : memref<3x8xf32, #tpu.memory_space<smem>>
    %89 = vector.extract_strided_slice %0 {offsets = [4, 0, 0], sizes = [1, 8, 128], strides = [1, 1, 1]} : vector<8x8x128xf32> to vector<1x8x128xf32>
    %90 = vector.shape_cast %89 : vector<1x8x128xf32> to vector<8x128xf32>
    %91 = vector.broadcast %88 : f32 to vector<8x128xf32>
    %92 = arith.mulf %91, %90 : vector<8x128xf32>
    %93 = arith.addf %87, %92 : vector<8x128xf32>
    %c1_25 = arith.constant 1 : index
    %c5_26 = arith.constant 5 : index
    %94 = memref.load %arg1[%c1_25, %c5_26] : memref<3x8xf32, #tpu.memory_space<smem>>
    %95 = vector.extract_strided_slice %0 {offsets = [5, 0, 0], sizes = [1, 8, 128], strides = [1, 1, 1]} : vector<8x8x128xf32> to vector<1x8x128xf32>
    %96 = vector.shape_cast %95 : vector<1x8x128xf32> to vector<8x128xf32>
    %97 = vector.broadcast %94 : f32 to vector<8x128xf32>
    %98 = arith.mulf %97, %96 : vector<8x128xf32>
    %99 = arith.addf %93, %98 : vector<8x128xf32>
    %c1_27 = arith.constant 1 : index
    %c6_28 = arith.constant 6 : index
    %100 = memref.load %arg1[%c1_27, %c6_28] : memref<3x8xf32, #tpu.memory_space<smem>>
    %101 = vector.extract_strided_slice %0 {offsets = [6, 0, 0], sizes = [1, 8, 128], strides = [1, 1, 1]} : vector<8x8x128xf32> to vector<1x8x128xf32>
    %102 = vector.shape_cast %101 : vector<1x8x128xf32> to vector<8x128xf32>
    %103 = vector.broadcast %100 : f32 to vector<8x128xf32>
    %104 = arith.mulf %103, %102 : vector<8x128xf32>
    %105 = arith.addf %99, %104 : vector<8x128xf32>
    %c1_29 = arith.constant 1 : index
    %c7_30 = arith.constant 7 : index
    %106 = memref.load %arg1[%c1_29, %c7_30] : memref<3x8xf32, #tpu.memory_space<smem>>
    %107 = vector.extract_strided_slice %0 {offsets = [7, 0, 0], sizes = [1, 8, 128], strides = [1, 1, 1]} : vector<8x8x128xf32> to vector<1x8x128xf32>
    %108 = vector.shape_cast %107 : vector<1x8x128xf32> to vector<8x128xf32>
    %109 = vector.broadcast %106 : f32 to vector<8x128xf32>
    %110 = arith.mulf %109, %108 : vector<8x128xf32>
    %111 = arith.addf %105, %110 : vector<8x128xf32>
    %112 = arith.negf %111 : vector<8x128xf32>
    %113 = math.exp %112 : vector<8x128xf32>
    %cst_31 = arith.constant 1.000000e+00 : f32
    %114 = vector.broadcast %cst_31 : f32 to vector<8x128xf32>
    %115 = arith.addf %114, %113 : vector<8x128xf32>
    %116 = arith.divf %114, %115 : vector<8x128xf32>
    %c1_32 = arith.constant 1 : index
    %117 = memref.load %arg3[%c1_32] : memref<3xf32, #tpu.memory_space<smem>>
    %118 = vector.broadcast %117 : f32 to vector<8x128xf32>
    %119 = arith.mulf %118, %116 : vector<8x128xf32>
    %120 = arith.addf %61, %119 : vector<8x128xf32>
    %c2_33 = arith.constant 2 : index
    %121 = memref.load %arg2[%c2_33] : memref<3xf32, #tpu.memory_space<smem>>
    %c2_34 = arith.constant 2 : index
    %c0_35 = arith.constant 0 : index
    %122 = memref.load %arg1[%c2_34, %c0_35] : memref<3x8xf32, #tpu.memory_space<smem>>
    %123 = vector.extract_strided_slice %0 {offsets = [0, 0, 0], sizes = [1, 8, 128], strides = [1, 1, 1]} : vector<8x8x128xf32> to vector<1x8x128xf32>
    %124 = vector.shape_cast %123 : vector<1x8x128xf32> to vector<8x128xf32>
    %125 = vector.broadcast %122 : f32 to vector<8x128xf32>
    %126 = arith.mulf %125, %124 : vector<8x128xf32>
    %127 = vector.broadcast %121 : f32 to vector<8x128xf32>
    %128 = arith.addf %127, %126 : vector<8x128xf32>
    %c2_36 = arith.constant 2 : index
    %c1_37 = arith.constant 1 : index
    %129 = memref.load %arg1[%c2_36, %c1_37] : memref<3x8xf32, #tpu.memory_space<smem>>
    %130 = vector.extract_strided_slice %0 {offsets = [1, 0, 0], sizes = [1, 8, 128], strides = [1, 1, 1]} : vector<8x8x128xf32> to vector<1x8x128xf32>
    %131 = vector.shape_cast %130 : vector<1x8x128xf32> to vector<8x128xf32>
    %132 = vector.broadcast %129 : f32 to vector<8x128xf32>
    %133 = arith.mulf %132, %131 : vector<8x128xf32>
    %134 = arith.addf %128, %133 : vector<8x128xf32>
    %c2_38 = arith.constant 2 : index
    %c2_39 = arith.constant 2 : index
    %135 = memref.load %arg1[%c2_38, %c2_39] : memref<3x8xf32, #tpu.memory_space<smem>>
    %136 = vector.extract_strided_slice %0 {offsets = [2, 0, 0], sizes = [1, 8, 128], strides = [1, 1, 1]} : vector<8x8x128xf32> to vector<1x8x128xf32>
    %137 = vector.shape_cast %136 : vector<1x8x128xf32> to vector<8x128xf32>
    %138 = vector.broadcast %135 : f32 to vector<8x128xf32>
    %139 = arith.mulf %138, %137 : vector<8x128xf32>
    %140 = arith.addf %134, %139 : vector<8x128xf32>
    %c2_40 = arith.constant 2 : index
    %c3_41 = arith.constant 3 : index
    %141 = memref.load %arg1[%c2_40, %c3_41] : memref<3x8xf32, #tpu.memory_space<smem>>
    %142 = vector.extract_strided_slice %0 {offsets = [3, 0, 0], sizes = [1, 8, 128], strides = [1, 1, 1]} : vector<8x8x128xf32> to vector<1x8x128xf32>
    %143 = vector.shape_cast %142 : vector<1x8x128xf32> to vector<8x128xf32>
    %144 = vector.broadcast %141 : f32 to vector<8x128xf32>
    %145 = arith.mulf %144, %143 : vector<8x128xf32>
    %146 = arith.addf %140, %145 : vector<8x128xf32>
    %c2_42 = arith.constant 2 : index
    %c4_43 = arith.constant 4 : index
    %147 = memref.load %arg1[%c2_42, %c4_43] : memref<3x8xf32, #tpu.memory_space<smem>>
    %148 = vector.extract_strided_slice %0 {offsets = [4, 0, 0], sizes = [1, 8, 128], strides = [1, 1, 1]} : vector<8x8x128xf32> to vector<1x8x128xf32>
    %149 = vector.shape_cast %148 : vector<1x8x128xf32> to vector<8x128xf32>
    %150 = vector.broadcast %147 : f32 to vector<8x128xf32>
    %151 = arith.mulf %150, %149 : vector<8x128xf32>
    %152 = arith.addf %146, %151 : vector<8x128xf32>
    %c2_44 = arith.constant 2 : index
    %c5_45 = arith.constant 5 : index
    %153 = memref.load %arg1[%c2_44, %c5_45] : memref<3x8xf32, #tpu.memory_space<smem>>
    %154 = vector.extract_strided_slice %0 {offsets = [5, 0, 0], sizes = [1, 8, 128], strides = [1, 1, 1]} : vector<8x8x128xf32> to vector<1x8x128xf32>
    %155 = vector.shape_cast %154 : vector<1x8x128xf32> to vector<8x128xf32>
    %156 = vector.broadcast %153 : f32 to vector<8x128xf32>
    %157 = arith.mulf %156, %155 : vector<8x128xf32>
    %158 = arith.addf %152, %157 : vector<8x128xf32>
    %c2_46 = arith.constant 2 : index
    %c6_47 = arith.constant 6 : index
    %159 = memref.load %arg1[%c2_46, %c6_47] : memref<3x8xf32, #tpu.memory_space<smem>>
    %160 = vector.extract_strided_slice %0 {offsets = [6, 0, 0], sizes = [1, 8, 128], strides = [1, 1, 1]} : vector<8x8x128xf32> to vector<1x8x128xf32>
    %161 = vector.shape_cast %160 : vector<1x8x128xf32> to vector<8x128xf32>
    %162 = vector.broadcast %159 : f32 to vector<8x128xf32>
    %163 = arith.mulf %162, %161 : vector<8x128xf32>
    %164 = arith.addf %158, %163 : vector<8x128xf32>
    %c2_48 = arith.constant 2 : index
    %c7_49 = arith.constant 7 : index
    %165 = memref.load %arg1[%c2_48, %c7_49] : memref<3x8xf32, #tpu.memory_space<smem>>
    %166 = vector.extract_strided_slice %0 {offsets = [7, 0, 0], sizes = [1, 8, 128], strides = [1, 1, 1]} : vector<8x8x128xf32> to vector<1x8x128xf32>
    %167 = vector.shape_cast %166 : vector<1x8x128xf32> to vector<8x128xf32>
    %168 = vector.broadcast %165 : f32 to vector<8x128xf32>
    %169 = arith.mulf %168, %167 : vector<8x128xf32>
    %170 = arith.addf %164, %169 : vector<8x128xf32>
    %171 = arith.negf %170 : vector<8x128xf32>
    %172 = math.exp %171 : vector<8x128xf32>
    %cst_50 = arith.constant 1.000000e+00 : f32
    %173 = vector.broadcast %cst_50 : f32 to vector<8x128xf32>
    %174 = arith.addf %173, %172 : vector<8x128xf32>
    %175 = arith.divf %173, %174 : vector<8x128xf32>
    %c2_51 = arith.constant 2 : index
    %176 = memref.load %arg3[%c2_51] : memref<3xf32, #tpu.memory_space<smem>>
    %177 = vector.broadcast %176 : f32 to vector<8x128xf32>
    %178 = arith.mulf %177, %175 : vector<8x128xf32>
    %179 = arith.addf %120, %178 : vector<8x128xf32>
    %180 = arith.negf %179 : vector<8x128xf32>
    %181 = math.exp %180 : vector<8x128xf32>
    %cst_52 = arith.constant 1.000000e+00 : f32
    %182 = vector.broadcast %cst_52 : f32 to vector<8x128xf32>
    %183 = arith.addf %182, %181 : vector<8x128xf32>
    %184 = arith.divf %182, %183 : vector<8x128xf32>
    %c0_53 = arith.constant 0 : index
    %c0_54 = arith.constant 0 : index
    %185 = vector.load %arg6[%c0_53, %c0_54] : memref<8x128xf32, #tpu.memory_space<vmem>>, vector<8x128xf32>
    tpu.vector_store %arg6[%c0_53, %c0_54], %184 {strides = array<i32>} : memref<8x128xf32, #tpu.memory_space<vmem>>, vector<8x128xf32>,
    return
  }
  func.func @transform_0(%arg0: i32) -> (i32, i32) {
    %c0_i32 = arith.constant 0 : i32
    %c0_i32_0 = arith.constant 0 : i32
    %c0_i32_1 = arith.constant 0 : i32
    return %c0_i32, %c0_i32_0 : i32, i32
  }
  func.func @transform_1(%arg0: i32) -> i32 {
    %c0_i32 = arith.constant 0 : i32
    %c0_i32_0 = arith.constant 0 : i32
    return %c0_i32 : i32
  }
  func.func @transform_2(%arg0: i32) -> i32 {
    %c0_i32 = arith.constant 0 : i32
    %c0_i32_0 = arith.constant 0 : i32
    return %c0_i32 : i32
  }
  func.func @transform_3(%arg0: i32) -> i32 {
    %c0_i32 = arith.constant 0 : i32
    %c0_i32_0 = arith.constant 0 : i32
    return %c0_i32 : i32
  }
  func.func @transform_4(%arg0: i32) -> (i32, i32, i32) {
    %c0_i32 = arith.constant 0 : i32
    %c0_i32_0 = arith.constant 0 : i32
    %c0_i32_1 = arith.constant 0 : i32
    return %c0_i32, %arg0, %c0_i32_0 : i32, i32, i32
  }
  func.func @transform_5(%arg0: i32) -> (i32, i32) {
    %c0_i32 = arith.constant 0 : i32
    %c0_i32_0 = arith.constant 0 : i32
    return %arg0, %c0_i32 : i32, i32
  }
}

</mosaic_0001>

<bundles_post_ra>
// kernel: mlp_forward.1
= control target key start
LH: loop header
LB: loop body
LE: loop exit
PB: predicated region body
PF: predicated region fallthrough
CT: control target
= control target key end

     0   :  { %11 = vsyncpa [#allocation4], 0  ;;  %s502_s0 = inlined_call_operand.vmem [shape: f32[3,8], index: 0, kind: input, shape index: {}]   ;;  %s503_s1 = inlined_call_operand.vmem [shape: f32[3], index: 1, kind: input, shape index: {}]   ;;  %s504_s2 = inlined_call_operand.vmem [shape: f32[3], index: 2, kind: input, shape index: {}]   ;;  %s505_s3 = inlined_call_operand.<no memory space> [shape: f32[1], index: 3, kind: input, shape index: {}]   ;;  %s506_s4 = inlined_call_operand.vmem [shape: f32[8,8,128], index: 4, kind: input, shape index: {}]   ;;  %s507_s5 = inlined_call_operand.vmem [shape: f32[8,128], index: 5, kind: output, shape index: {}]  }
   0x1   :  { %12 = vsyncpa [#allocation6], 0  ;;  %s27_s20 = sshll.u32 %s503_s1, 4  ;;  %s18_s23 = sshll.u32 %s502_s0, 4  ;;  %s28_s20 = int_to_ptr.vmem [resolvable:$true] %s27_s20  ;;  %s19_s23 = int_to_ptr.vmem [resolvable:$true] %s18_s23 }
   0x2   :  { %s354_s24 = smov [#allocation5]   ;;  %s355_s25 = smov [#allocation3]  }
   0x3   :  { %30 = dma.vmem_to_smem %s28_s20, 16, %s354_s24, [#allocation6]  }
   0x4   :  { %21 = dma.vmem_to_smem %s19_s23, 64, %s355_s25, [#allocation4]  }
   0x5   :  { %s36_s28 = sshll.u32 %s504_s2, 4  ;;  %s356_s29 = smov [#allocation7]   ;;  %s37_s28 = int_to_ptr.vmem [resolvable:$true] %s36_s28 }
   0x6   :  { %39 = dma.vmem_to_smem %s37_s28, 16, %s356_s29, [#allocation6]  }
   0x7   :  { %350 = dma.done.wait [#allocation4], 64  }
   0x8   :  { %351 = vsyncadd [#allocation4], 4294967232 }
   0x9   :  { %352 = dma.done.wait [#allocation6], 32  }
   0xa   :  { %353 = vsyncadd [#allocation6], 4294967264 }
   0xb   :  { %56 = sfence }
   0xc   :  { %s65_s1 = sld [smem:[#allocation5]]  ;;  %v399_v0 = vld [vmem:[%s506_s4] sm:$0xff]  ;;  %v404_v1 = vld [vmem:[%s506_s4 + $0x8] sm:$0xff]  ;;  %v411_v2 = vld [vmem:[%s506_s4 + $0x10] sm:$0xff] }
   0xd   :  { %s66_s30 = sld [smem:[#allocation3]]  ;;  %v421_v7 = vld [vmem:[%s506_s4 + $0x18] sm:$0xff]  ;;  %v430_v13 = vld [vmem:[%s506_s4 + $0x20] sm:$0xff]  ;;  %v436_v17 = vld [vmem:[%s506_s4 + $0x28] sm:$0xff] }
   0xe   :  { %s264_s0 = sld [smem:[#allocation3 + $0x1]]  ;;  %v443_v21 = vld [vmem:[%s506_s4 + $0x30] sm:$0xff]  ;;  %v451_v23 = vld [vmem:[%s506_s4 + $0x38] sm:$0xff] }
   0xf   :  { %s265_s6 = sld [smem:[#allocation3 + $0x2]] }
  0x10   :  { %s266_s7 = sld [smem:[#allocation3 + $0x3]] }
  0x11   :  { %s267_s10 = sld [smem:[#allocation3 + $0x4]] }
  0x12   :  { %s406_s12 = sld [smem:[#allocation3 + $0x5]]  ;;  %v69_v4 = vstv %s65_s1 }
  0x13   :  { %v67_v3 = vstv %s66_s30  ;;  %s413_s15 = sld [smem:[#allocation3 + $0x6]] }
  0x14   :  { %v68_v5 = vmul.f32 %v67_v3, %v399_v0  ;;  %v72_v6 = vstv %s264_s0  ;;  %s416_s16 = sld [smem:[#allocation3 + $0x7]] }
  0x15   :  { %v73_v8 = vmul.f32 %v72_v6, %v404_v1  ;;  %v76_v9 = vstv %s265_s6  ;;  %s425_s19 = sld [smem:[#allocation5 + $0x1]] }
  0x16   :  { %v70_v10 = vadd.f32 %v69_v4, %v68_v5  ;;  %v77_v11 = vmul.f32 %v76_v9, %v411_v2  ;;  %v80_v12 = vstv %s266_s7  ;;  %s273_s22 = sld [smem:[#allocation3 + $0x80]] }
  0x17   :  { %v84_v14 = vstv %s267_s10  ;;  %v81_v16 = vmul.f32 %v80_v12, %v421_v7  ;;  %s274_s23 = sld [smem:[#allocation3 + $0x81]] }
  0x18   :  { %v74_v15 = vadd.f32 %v73_v8, %v70_v10  ;;  %v88_v18 = vstv %s406_s12  ;;  %s275_s26 = sld [smem:[#allocation3 + $0x82]]  ;;  %v85_v20 = vmul.f32 %v84_v14, %v430_v13 }
  0x19   :  { %s276_s27 = sld [smem:[#allocation3 + $0x83]]  ;;  %v92_v22 = vstv %s413_s15  ;;  %v89_v25 = vmul.f32 %v88_v18, %v436_v17 }
  0x1a   :  { %v78_v19 = vadd.f32 %v77_v11, %v74_v15  ;;  %s446_s1 = sld [smem:[#allocation3 + $0x84]]  ;;  %v96_v26 = vstv %s416_s16  ;;  %v93_v30 = vmul.f32 %v92_v22, %v443_v21 }
  0x1b   :  { %s455_s6 = sld [smem:[#allocation3 + $0x85]]  ;;  %v128_v28 = vstv %s425_s19  ;;  %v97_v33 = vmul.f32 %v96_v26, %v451_v23 }
  0x1c   :  { %v82_v24 = vadd.f32 %v81_v16, %v78_v19  ;;  %v126_v27 = vstv %s273_s22  ;;  %s458_s7 = sld [smem:[#allocation3 + $0x86]] }
  0x1d   :  { %v127_v31 = vmul.f32 %v126_v27, %v399_v0  ;;  %v131_v32 = vstv %s274_s23  ;;  %s462_s4 = sld [smem:[#allocation3 + $0x87]] }
  0x1e   :  { %v86_v29 = vadd.f32 %v85_v20, %v82_v24  ;;  %v132_v34 = vmul.f32 %v131_v32, %v404_v1  ;;  %v135_v35 = vstv %s275_s26  ;;  %s467_s8 = sld [smem:[#allocation5 + $0x2]] }
  0x1f   :  { %v129_v37 = vadd.f32 %v128_v28, %v127_v31  ;;  %v136_v38 = vmul.f32 %v135_v35, %v411_v2  ;;  %v139_v39 = vstv %s276_s27  ;;  %s284_s9 = sld [smem:[#allocation3 + $0x100]] }
  0x20   :  { %v90_v36 = vadd.f32 %v89_v25, %v86_v29  ;;  %v143_v40 = vstv %s446_s1  ;;  %v140_v43 = vmul.f32 %v139_v39, %v421_v7  ;;  %s285_s10 = sld [smem:[#allocation3 + $0x101]] }
  0x21   :  { %v133_v42 = vadd.f32 %v132_v34, %v129_v37  ;;  %v147_v44 = vstv %s455_s6  ;;  %s286_s2 = sld [smem:[#allocation3 + $0x102]]  ;;  %v144_v47 = vmul.f32 %v143_v40, %v430_v13 }
  0x22   :  { %v94_v41 = vadd.f32 %v93_v30, %v90_v36  ;;  %v151_v48 = vstv %s458_s7  ;;  %s287_s11 = sld [smem:[#allocation3 + $0x103]]  ;;  %v148_v51 = vmul.f32 %v147_v44, %v436_v17 }
  0x23   :  { %v137_v46 = vadd.f32 %v136_v38, %v133_v42  ;;  %s288_s12 = sld [smem:[#allocation3 + $0x104]]  ;;  %v155_v52 = vstv %s462_s4  ;;  %v152_v53 = vmul.f32 %v151_v48, %v443_v21 }
  0x24   :  { %v98_v45 = vadd.f32 %v97_v33, %v94_v41  ;;  %s289_s13 = sld [smem:[#allocation3 + $0x105]]  ;;  %v185_v55 = vstv %s467_s8  ;;  %v156_v59 = vmul.f32 %v155_v52, %v451_v23  ;;  %v122_v52 = vstv %s505_s3 }
  0x25   :  { %v141_v50 = vadd.f32 %v140_v43, %v137_v46  ;;  %v183_v54 = vstv %s284_s9  ;;  %s478_s14 = sld [smem:[#allocation3 + $0x106]] }
  0x26   :  { %v271_v49 = vmul.f32 -1.442695, %v98_v45  ;;  %v184_v57 = vmul.f32 %v183_v54, %v399_v0  ;;  %v188_v58 = vstv %s285_s10  ;;  %s291_s15 = sld [smem:[#allocation3 + $0x107]] }
  0x27   :  { %v145_v56 = vadd.f32 %v144_v47, %v141_v50  ;;  %v189_v60 = vmul.f32 %v188_v58, %v404_v1  ;;  %v192_v61 = vstv %s286_s2  ;;  %s118_s16 = sld [smem:[#allocation7]] }
  0x28   :  { %298 = vpow2.f32 %v271_v49  ;;  %v186_v63 = vadd.f32 %v185_v55, %v184_v57  ;;  %v193_v3 = vmul.f32 %v192_v61, %v411_v2  ;;  %v196_v4 = vstv %s287_s11  ;;  %s282_s17 = sld [smem:[#allocation7 + $0x1]] }
  0x29   :  { %v149_v62 = vadd.f32 %v148_v51, %v145_v56  ;;  %v200_v5 = vstv %s288_s12  ;;  %v197_v9 = vmul.f32 %v196_v4, %v421_v7  ;;  %s293_s18 = sld [smem:[#allocation7 + $0x2]] }
  0x2a   :  { %v190_v8 = vadd.f32 %v189_v60, %v186_v63  ;;  %v204_v10 = vstv %s289_s13  ;;  %v201_v14 = vmul.f32 %v200_v5, %v430_v13 }
  0x2b   :  { %v153_v6 = vadd.f32 %v152_v53, %v149_v62  ;;  %v208_v15 = vstv %s478_s14  ;;  %v205_v19 = vmul.f32 %v204_v10, %v436_v17 }
  0x2c   :  { %v194_v12 = vadd.f32 %v193_v3, %v190_v8  ;;  %v212_v2 = vstv %s291_s15  ;;  %v209_v22 = vmul.f32 %v208_v15, %v443_v21 }
  0x2d   :  { %v157_v11 = vadd.f32 %v156_v59, %v153_v6  ;;  %v213_v7 = vmul.f32 %v212_v2, %v451_v23  ;;  %v119_v46 = vstv %s118_s16 }
  0x2e   :  { %v299_v0 = vpop.eup %298  ;;  %v198_v18 = vadd.f32 %v197_v9, %v194_v12  ;;  %v178_v54 = vstv %s282_s17 }
  0x2f   :  { %v102_v1 = vadd.f32 1.0, %v299_v0  ;;  %v281_v16 = vmul.f32 -1.442695, %v157_v11  ;;  %v235_v63 = vstv %s293_s18 }
  0x30   :  { %v202_v20 = vadd.f32 %v201_v14, %v198_v18 }
  0x31   :  { %300 = vrcp.f32 %v102_v1  ;;  %vm108_vm0 = vweird.f32 %v102_v1  ;;  %v114_v33 = vand.u32 2147483648, %v102_v1  ;;  %v112_v35 = vand.u32 2147483647, %v102_v1 }
  0x32   :  { %302 = vpow2.f32 %v281_v16  ;;  %v206_v24 = vadd.f32 %v205_v19, %v202_v20 }
  0x33   :  { %v115_v39 = vor.u32 1.1754944e-38, %v114_v33  ;;  %vm113_vm5 = vcmp.eq.f32.partialorder %v112_v35, 8.507059e+37 }
  0x34   :  { %v210_v25 = vadd.f32 %v209_v22, %v206_v24 }
  0x36   :  { %v214_v13 = vadd.f32 %v213_v7, %v210_v25 }
  0x37   :  { %v301_v26 = vpop.eup %300 }
  0x38   :  { %v303_v27 = vpop.eup %302  ;;  %v104_v28 = vmul.f32 %v301_v26, %v102_v1  ;;  %v292_v31 = vmul.f32 -1.442695, %v214_v13  ;;  %vm109_vm1 = vweird.f32 %v301_v26 }
  0x39   :  { %v161_v29 = vadd.f32 1.0, %v303_v27  ;;  %vm490_vm2 = vmor %vm108_vm0, %vm109_vm1 }
  0x3a   :  { %v105_v30 = vsub.f32 1.0, %v104_v28 }
  0x3b   :  { %304 = vrcp.f32 %v161_v29  ;;  %vm167_vm3 = vweird.f32 %v161_v29  ;;  %v173_v40 = vand.u32 2147483648, %v161_v29  ;;  %v171_v43 = vand.u32 2147483647, %v161_v29 }
  0x3c   :  { %306 = vpow2.f32 %v292_v31  ;;  %v106_v17 = vmul.f32 %v301_v26, %v105_v30 }
  0x3d   :  { %v174_v47 = vor.u32 1.1754944e-38, %v173_v40  ;;  %vm172_vm7 = vcmp.eq.f32.partialorder %v171_v43, 8.507059e+37 }
  0x3e   :  { %v107_v34 = vadd.f32 %v301_v26, %v106_v17 }
  0x40   :  { %v111_v41 = vsel %vm490_vm2, %v301_v26, %v107_v34 }
  0x41   :  { %v305_v32 = vpop.eup %304  ;;  %v116_v45 = vsel %vm113_vm5, %v115_v39, %v111_v41 }
  0x42   :  { %v307_v21 = vpop.eup %306  ;;  %v163_v23 = vmul.f32 %v305_v32, %v161_v29  ;;  %vm168_vm4 = vweird.f32 %v305_v32  ;;  %v120_v50 = vmul.f32 %v119_v46, %v116_v45 }
  0x43   :  { %v218_v37 = vadd.f32 1.0, %v307_v21  ;;  %vm169_vm6 = vmor %vm167_vm3, %vm168_vm4 }
  0x44   :  { %v164_v38 = vsub.f32 1.0, %v163_v23  ;;  %v123_v58 = vadd.f32 %v122_v52, %v120_v50 }
  0x45   :  { %308 = vrcp.f32 %v218_v37  ;;  %v230_v55 = vand.u32 2147483648, %v218_v37  ;;  %vm224_vm8 = vweird.f32 %v218_v37  ;;  %v228_v57 = vand.u32 2147483647, %v218_v37 }
  0x46   :  { %v165_v42 = vmul.f32 %v305_v32, %v164_v38 }
  0x47   :  { %v231_v61 = vor.u32 1.1754944e-38, %v230_v55  ;;  %vm229_vm11 = vcmp.eq.f32.partialorder %v228_v57, 8.507059e+37 }
  0x48   :  { %v166_v44 = vadd.f32 %v305_v32, %v165_v42 }
  0x4a   :  { %v170_v48 = vsel %vm169_vm6, %v305_v32, %v166_v44 }
  0x4b   :  { %v309_v49 = vpop.eup %308  ;;  %v175_v53 = vsel %vm172_vm7, %v174_v47, %v170_v48 }
  0x4c   :  { %v220_v51 = vmul.f32 %v309_v49, %v218_v37  ;;  %vm225_vm9 = vweird.f32 %v309_v49  ;;  %v179_v59 = vmul.f32 %v178_v54, %v175_v53 }
  0x4d   :  { %vm226_vm10 = vmor %vm224_vm8, %vm225_vm9 }
  0x4e   :  { %v221_v56 = vsub.f32 1.0, %v220_v51  ;;  %v180_v3 = vadd.f32 %v179_v59, %v123_v58 }
  0x50   :  { %v222_v60 = vmul.f32 %v309_v49, %v221_v56 }
  0x52   :  { %v223_v62 = vadd.f32 %v309_v49, %v222_v60 }
  0x54   :  { %v227_v4 = vsel %vm226_vm10, %v309_v49, %v223_v62 }
  0x55   :  { %v232_v5 = vsel %vm229_vm11, %v231_v61, %v227_v4 }
  0x56   :  { %v236_v6 = vmul.f32 %v235_v63, %v232_v5 }
  0x58   :  { %v237_v8 = vadd.f32 %v236_v6, %v180_v3 }
  0x5a   :  { %v294_v9 = vmul.f32 -1.442695, %v237_v8 }
  0x5c   :  { %310 = vpow2.f32 %v294_v9 }
  0x62   :  { %v311_v10 = vpop.eup %310 }
  0x63   :  { %v241_v0 = vadd.f32 1.0, %v311_v10 }
  0x65   :  { %312 = vrcp.f32 %v241_v0  ;;  %v253_v14 = vand.u32 2147483648, %v241_v0  ;;  %vm247_vm12 = vweird.f32 %v241_v0  ;;  %v251_v15 = vand.u32 2147483647, %v241_v0 }
  0x67   :  { %v254_v18 = vor.u32 1.1754944e-38, %v253_v14  ;;  %vm252_vm15 = vcmp.eq.f32.partialorder %v251_v15, 8.507059e+37 }
  0x6b   :  { %v313_v11 = vpop.eup %312 }
  0x6c   :  { %v243_v12 = vmul.f32 %v313_v11, %v241_v0  ;;  %vm248_vm13 = vweird.f32 %v313_v11 }
  0x6d   :  { %vm249_vm14 = vmor %vm247_vm12, %vm248_vm13 }
  0x6e   :  { %v244_v1 = vsub.f32 1.0, %v243_v12 }
  0x70   :  { %v245_v16 = vmul.f32 %v313_v11, %v244_v1 }
  0x72   :  { %v246_v19 = vadd.f32 %v313_v11, %v245_v16 }
  0x74   :  { %v250_v2 = vsel %vm249_vm14, %v313_v11, %v246_v19 }
  0x75   :  { %v255_v20 = vsel %vm252_vm15, %v254_v18, %v250_v2 }
  0x76   :  { %257 = vst [vmem:[%s507_s5] sm:$0xff] %v255_v20 }
  0x77   :  { %262 = vsyncpa [#allocation4], 1 }
  0x78   :  { %263 = vsyncpa [#allocation6], 1 }

</bundles_post_ra>
